<compile_context>
chip_gen: v7x
topology: tpu7x:2x2x1
jax: 0.10.0
libtpu: 0.0.40
codegen_flags: <defaults>
</compile_context>

<pallas_src>
import functools

import jax
import jax.numpy as jnp
from jax.experimental import pallas as pl
from jax.experimental.pallas import tpu as pltpu

LANES = 128
MAX_BLOCK_ROWS = 1024        # 1024 x 128 x 4B = 512 KiB per f32 input tile
NUM_SPLITS = 2               # leading "parallel" axis -> 2 TensorCores on v7x
SMOOTH = 1.0


def _dice_partials_kernel(i_ref, t_ref, w_ref, itw_ref, iw_ref, tw_ref, *,
                          rows, block_rows, blocks_per_split):
    c = pl.program_id(0)      # parallel split (one per TensorCore on v7x)
    k = pl.program_id(1)      # reduction step within the split

    @pl.when(k == 0)
    def _init():
        itw_ref[...] = jnp.zeros_like(itw_ref)
        iw_ref[...] = jnp.zeros_like(iw_ref)
        tw_ref[...] = jnp.zeros_like(tw_ref)

    i = i_ref[...].astype(jnp.float32)
    t = t_ref[...].astype(jnp.float32)
    w = w_ref[...].astype(jnp.float32)

    # Mask rows past the logical end: ragged last block, or surplus blocks on
    # the second split when the block count is odd.  Those rows hold stale
    # VMEM data, so use `where` (not multiply) to drop them.
    blk = c * blocks_per_split + k
    row_start = blk * block_rows
    row_ids = jax.lax.broadcasted_iota(jnp.int32, (block_rows, 1), 0) + row_start
    valid = row_ids < rows

    iw = i * w
    itw = jnp.where(valid, iw * t, 0.0)
    iw_m = jnp.where(valid, iw, 0.0)
    tw_m = jnp.where(valid, t * w, 0.0)

    # Keep partials in lane/sublane (vreg) form: fold the tile to
    # (block_rows/8, 8, 128) and add over the leading dim (pure VPU adds,
    # hidden under the DMA).  The cross-lane reduce happens once, in JAX.
    def fold(x):
        return x.reshape(block_rows // 8, 8, LANES).sum(axis=0)[None]

    itw_ref[...] += fold(itw)
    iw_ref[...] += fold(iw_m)
    tw_ref[...] += fold(tw_m)


def _dice_from_sums(intersection, sum_iw, sum_tw):
    denominator = sum_iw + sum_tw
    return 1.0 - (2.0 * intersection + SMOOTH) / (denominator + SMOOTH)


def _jax_partial_sums(i, t, w):
    i = i.astype(jnp.float32)
    t = t.astype(jnp.float32)
    w = w.astype(jnp.float32)
    return jnp.sum(i * t * w), jnp.sum(i * w), jnp.sum(t * w)


def dice_loss_voxel_weighted(inp, target, weight):
    """Pallas TPU implementation of DiceLossVoxelWeighted.forward. Scalar out."""
    iflat = jnp.reshape(inp, (-1,))
    tflat = jnp.reshape(target, (-1,))
    wflat = jnp.reshape(weight, (-1,))
    n = iflat.shape[0]

    main = (n // LANES) * LANES          # lane-aligned prefix handled by kernel
    rows = main // LANES

    # Tiny inputs: a kernel launch is not worth it.
    if rows < 8:
        return _dice_from_sums(*_jax_partial_sums(iflat, tflat, wflat))

    # Lane-aligned prefix viewed as (rows, 128).  When n is a multiple of 128
    # (the common case for voxel volumes, and the test below) this reshape is
    # free -- no pad, no copy.
    if main == n:
        i2 = iflat.reshape(rows, LANES)
        t2 = tflat.reshape(rows, LANES)
        w2 = wflat.reshape(rows, LANES)
        has_tail = False
    else:
        i2 = iflat[:main].reshape(rows, LANES)
        t2 = tflat[:main].reshape(rows, LANES)
        w2 = wflat[:main].reshape(rows, LANES)
        has_tail = True

    block_rows = min(MAX_BLOCK_ROWS, (rows // 8) * 8)   # multiple of 8, <= rows
    num_blocks = pl.cdiv(rows, block_rows)
    blocks_per_split = pl.cdiv(num_blocks, NUM_SPLITS)

    def in_map(c, k):
        # Clamp so the requested block always lies inside the array; any
        # duplicated / past-the-end rows are zeroed by the in-kernel mask.
        return (jnp.minimum(c * blocks_per_split + k, num_blocks - 1), 0)

    def out_map(c, k):
        return (c, 0, 0)

    kernel = functools.partial(
        _dice_partials_kernel,
        rows=rows, block_rows=block_rows, blocks_per_split=blocks_per_split)

    part_shape = jax.ShapeDtypeStruct((NUM_SPLITS, 8, LANES), jnp.float32)
    in_spec = pl.BlockSpec((block_rows, LANES), in_map)
    out_spec = pl.BlockSpec((1, 8, LANES), out_map)

    itw_p, iw_p, tw_p = pl.pallas_call(
        kernel,
        out_shape=(part_shape, part_shape, part_shape),
        grid_spec=pltpu.PrefetchScalarGridSpec(
            num_scalar_prefetch=0,
            grid=(NUM_SPLITS, blocks_per_split),
            in_specs=[in_spec, in_spec, in_spec],
            out_specs=(out_spec, out_spec, out_spec),
        ),
        compiler_params=pltpu.CompilerParams(
            dimension_semantics=("parallel", "arbitrary")),
    )(i2, t2, w2)

    intersection = jnp.sum(itw_p)
    sum_iw = jnp.sum(iw_p)
    sum_tw = jnp.sum(tw_p)

    if has_tail:  # <128-element remainder, negligible: plain JAX.
        t_itw, t_iw, t_tw = _jax_partial_sums(
            iflat[main:], tflat[main:], wflat[main:])
        intersection = intersection + t_itw
        sum_iw = sum_iw + t_iw
        sum_tw = sum_tw + t_tw

    return _dice_from_sums(intersection, sum_iw, sum_tw)


def _reference(inp, target, weight):
    i = jnp.reshape(inp, (-1,)).astype(jnp.float32)
    t = jnp.reshape(target, (-1,)).astype(jnp.float32)
    w = jnp.reshape(weight, (-1,)).astype(jnp.float32)
    intersection = jnp.sum(i * t * w)
    denominator = jnp.sum(i * w) + jnp.sum(t * w)
    return 1.0 - (2.0 * intersection + SMOOTH) / (denominator + SMOOTH)


if __name__ == "__main__":
    key = jax.random.PRNGKey(0)
    k1, k2, k3 = jax.random.split(key, 3)
    shape = (2, 4, 16, 16)  # NCHW-style voxel probabilities / labels / weights
    inp = jax.nn.sigmoid(jax.random.normal(k1, shape, dtype=jnp.float32))
    target = (jax.random.uniform(k2, shape) > 0.5).astype(jnp.float32)
    weight = jax.random.uniform(k3, shape, dtype=jnp.float32)

    loss = dice_loss_voxel_weighted(inp, target, weight)
    jax.block_until_ready(loss)

    ref = _reference(inp, target, weight)
    assert jnp.allclose(loss, ref, rtol=1e-5, atol=1e-6), (loss, ref)
    print("KERNEL_OK")
</pallas_src>

<mosaic_0001>
module attributes {stable_mosaic.version = 11 : i64} {
  func.func @_dice_partials_kernel(%arg0: i32, %arg1: i32, %arg2: memref<16x128xf32, #tpu.memory_space<vmem>>, %arg3: memref<16x128xf32, #tpu.memory_space<vmem>>, %arg4: memref<16x128xf32, #tpu.memory_space<vmem>>, %arg5: memref<1x8x128xf32, #tpu.memory_space<vmem>>, %arg6: memref<1x8x128xf32, #tpu.memory_space<vmem>>, %arg7: memref<1x8x128xf32, #tpu.memory_space<vmem>>) attributes {dimension_semantics = [#tpu.dimension_semantics<parallel>, #tpu.dimension_semantics<arbitrary>], iteration_bounds = array<i64: 2, 1>, scalar_prefetch = 0 : i64, scratch_operands = 0 : i64, tpu.core_type = #tpu.core_type<tc>, window_params = [{transform_indices = @transform_0, window_bounds = array<i64: 16, 128>}, {transform_indices = @transform_1, window_bounds = array<i64: 16, 128>}, {transform_indices = @transform_2, window_bounds = array<i64: 16, 128>}, {transform_indices = @transform_3, window_bounds = array<i64: 1, 8, 128>}, {transform_indices = @transform_4, window_bounds = array<i64: 1, 8, 128>}, {transform_indices = @transform_5, window_bounds = array<i64: 1, 8, 128>}]} {
    %c0_i32 = arith.constant 0 : i32
    %0 = arith.cmpi eq, %arg1, %c0_i32 : i32
    %1 = arith.extui %0 : i1 to i32
    %c0_i32_0 = arith.constant 0 : i32
    %2 = arith.cmpi ne, %1, %c0_i32_0 : i32
    scf.if %2 {
      %cst_30 = arith.constant 0.000000e+00 : f32
      %47 = vector.broadcast %cst_30 : f32 to vector<1x8x128xf32>
      %c0_31 = arith.constant 0 : index
      %c0_32 = arith.constant 0 : index
      %c0_33 = arith.constant 0 : index
      %48 = vector.load %arg5[%c0_31, %c0_32, %c0_33] : memref<1x8x128xf32, #tpu.memory_space<vmem>>, vector<1x8x128xf32>
      tpu.vector_store %arg5[%c0_31, %c0_32, %c0_33], %47 {strides = array<i32>} : memref<1x8x128xf32, #tpu.memory_space<vmem>>, vector<1x8x128xf32>,
      %cst_34 = arith.constant 0.000000e+00 : f32
      %49 = vector.broadcast %cst_34 : f32 to vector<1x8x128xf32>
      %c0_35 = arith.constant 0 : index
      %c0_36 = arith.constant 0 : index
      %c0_37 = arith.constant 0 : index
      %50 = vector.load %arg6[%c0_35, %c0_36, %c0_37] : memref<1x8x128xf32, #tpu.memory_space<vmem>>, vector<1x8x128xf32>
      tpu.vector_store %arg6[%c0_35, %c0_36, %c0_37], %49 {strides = array<i32>} : memref<1x8x128xf32, #tpu.memory_space<vmem>>, vector<1x8x128xf32>,
      %cst_38 = arith.constant 0.000000e+00 : f32
      %51 = vector.broadcast %cst_38 : f32 to vector<1x8x128xf32>
      %c0_39 = arith.constant 0 : index
      %c0_40 = arith.constant 0 : index
      %c0_41 = arith.constant 0 : index
      %52 = vector.load %arg7[%c0_39, %c0_40, %c0_41] : memref<1x8x128xf32, #tpu.memory_space<vmem>>, vector<1x8x128xf32>
      tpu.vector_store %arg7[%c0_39, %c0_40, %c0_41], %51 {strides = array<i32>} : memref<1x8x128xf32, #tpu.memory_space<vmem>>, vector<1x8x128xf32>,
    } else {
    }
    %c0 = arith.constant 0 : index
    %c0_1 = arith.constant 0 : index
    %3 = vector.load %arg2[%c0, %c0_1] : memref<16x128xf32, #tpu.memory_space<vmem>>, vector<16x128xf32>
    %c0_2 = arith.constant 0 : index
    %c0_3 = arith.constant 0 : index
    %4 = vector.load %arg3[%c0_2, %c0_3] : memref<16x128xf32, #tpu.memory_space<vmem>>, vector<16x128xf32>
    %c0_4 = arith.constant 0 : index
    %c0_5 = arith.constant 0 : index
    %5 = vector.load %arg4[%c0_4, %c0_5] : memref<16x128xf32, #tpu.memory_space<vmem>>, vector<16x128xf32>
    %c1_i32 = arith.constant 1 : i32
    %6 = arith.muli %arg0, %c1_i32 : i32
    %7 = arith.addi %6, %arg1 : i32
    %c16_i32 = arith.constant 16 : i32
    %8 = arith.muli %7, %c16_i32 : i32
    %9 = tpu.iota {dimensions = array<i32: 0>} : vector<16x1xi32>
    %10 = vector.broadcast %8 : i32 to vector<16x1xi32>
    %11 = arith.addi %9, %10 : vector<16x1xi32>
    %c16_i32_6 = arith.constant 16 : i32
    %12 = vector.broadcast %c16_i32_6 : i32 to vector<16x1xi32>
    %13 = arith.cmpi slt, %11, %12 : vector<16x1xi32>
    %14 = arith.mulf %3, %5 : vector<16x128xf32>
    %15 = arith.mulf %14, %4 : vector<16x128xf32>
    %cst = arith.constant 0.000000e+00 : f32
    %16 = vector.shape_cast %13 : vector<16x1xi1> to vector<16x1xi1>
    %17 = vector.broadcast %16 : vector<16x1xi1> to vector<16x128xi1>
    %18 = vector.broadcast %cst : f32 to vector<16x128xf32>
    %19 = arith.select %17, %15, %18 : vector<16x128xi1>, vector<16x128xf32>
    %cst_7 = arith.constant 0.000000e+00 : f32
    %20 = vector.shape_cast %13 : vector<16x1xi1> to vector<16x1xi1>
    %21 = vector.broadcast %20 : vector<16x1xi1> to vector<16x128xi1>
    %22 = vector.broadcast %cst_7 : f32 to vector<16x128xf32>
    %23 = arith.select %21, %14, %22 : vector<16x128xi1>, vector<16x128xf32>
    %24 = arith.mulf %4, %5 : vector<16x128xf32>
    %cst_8 = arith.constant 0.000000e+00 : f32
    %25 = vector.shape_cast %13 : vector<16x1xi1> to vector<16x1xi1>
    %26 = vector.broadcast %25 : vector<16x1xi1> to vector<16x128xi1>
    %27 = vector.broadcast %cst_8 : f32 to vector<16x128xf32>
    %28 = arith.select %26, %24, %27 : vector<16x128xi1>, vector<16x128xf32>
    %c0_9 = arith.constant 0 : index
    %c0_10 = arith.constant 0 : index
    %c0_11 = arith.constant 0 : index
    %29 = vector.load %arg5[%c0_9, %c0_10, %c0_11] : memref<1x8x128xf32, #tpu.memory_space<vmem>>, vector<1x8x128xf32>
    %30 = vector.shape_cast %19 : vector<16x128xf32> to vector<2x8x128xf32>
    %cst_12 = arith.constant dense<0.000000e+00> : vector<8x128xf32>
    %31 = vector.multi_reduction <add>, %30, %cst_12 [0] : vector<2x8x128xf32> to vector<8x128xf32>
    %32 = vector.shape_cast %31 : vector<8x128xf32> to vector<1x8x128xf32>
    %33 = arith.addf %29, %32 : vector<1x8x128xf32>
    %c0_13 = arith.constant 0 : index
    %c0_14 = arith.constant 0 : index
    %c0_15 = arith.constant 0 : index
    %34 = vector.load %arg5[%c0_13, %c0_14, %c0_15] : memref<1x8x128xf32, #tpu.memory_space<vmem>>, vector<1x8x128xf32>
    tpu.vector_store %arg5[%c0_13, %c0_14, %c0_15], %33 {strides = array<i32>} : memref<1x8x128xf32, #tpu.memory_space<vmem>>, vector<1x8x128xf32>,
    %c0_16 = arith.constant 0 : index
    %c0_17 = arith.constant 0 : index
    %c0_18 = arith.constant 0 : index
    %35 = vector.load %arg6[%c0_16, %c0_17, %c0_18] : memref<1x8x128xf32, #tpu.memory_space<vmem>>, vector<1x8x128xf32>
    %36 = vector.shape_cast %23 : vector<16x128xf32> to vector<2x8x128xf32>
    %cst_19 = arith.constant dense<0.000000e+00> : vector<8x128xf32>
    %37 = vector.multi_reduction <add>, %36, %cst_19 [0] : vector<2x8x128xf32> to vector<8x128xf32>
    %38 = vector.shape_cast %37 : vector<8x128xf32> to vector<1x8x128xf32>
    %39 = arith.addf %35, %38 : vector<1x8x128xf32>
    %c0_20 = arith.constant 0 : index
    %c0_21 = arith.constant 0 : index
    %c0_22 = arith.constant 0 : index
    %40 = vector.load %arg6[%c0_20, %c0_21, %c0_22] : memref<1x8x128xf32, #tpu.memory_space<vmem>>, vector<1x8x128xf32>
    tpu.vector_store %arg6[%c0_20, %c0_21, %c0_22], %39 {strides = array<i32>} : memref<1x8x128xf32, #tpu.memory_space<vmem>>, vector<1x8x128xf32>,
    %c0_23 = arith.constant 0 : index
    %c0_24 = arith.constant 0 : index
    %c0_25 = arith.constant 0 : index
    %41 = vector.load %arg7[%c0_23, %c0_24, %c0_25] : memref<1x8x128xf32, #tpu.memory_space<vmem>>, vector<1x8x128xf32>
    %42 = vector.shape_cast %28 : vector<16x128xf32> to vector<2x8x128xf32>
    %cst_26 = arith.constant dense<0.000000e+00> : vector<8x128xf32>
    %43 = vector.multi_reduction <add>, %42, %cst_26 [0] : vector<2x8x128xf32> to vector<8x128xf32>
    %44 = vector.shape_cast %43 : vector<8x128xf32> to vector<1x8x128xf32>
    %45 = arith.addf %41, %44 : vector<1x8x128xf32>
    %c0_27 = arith.constant 0 : index
    %c0_28 = arith.constant 0 : index
    %c0_29 = arith.constant 0 : index
    %46 = vector.load %arg7[%c0_27, %c0_28, %c0_29] : memref<1x8x128xf32, #tpu.memory_space<vmem>>, vector<1x8x128xf32>
    tpu.vector_store %arg7[%c0_27, %c0_28, %c0_29], %45 {strides = array<i32>} : memref<1x8x128xf32, #tpu.memory_space<vmem>>, vector<1x8x128xf32>,
    return
  }
  func.func @transform_0(%arg0: i32, %arg1: i32) -> (i32, i32) {
    %c1_i32 = arith.constant 1 : i32
    %0 = arith.muli %arg0, %c1_i32 : i32
    %1 = arith.addi %0, %arg1 : i32
    %c0_i32 = arith.constant 0 : i32
    %2 = arith.minsi %1, %c0_i32 : i32
    %c0_i32_0 = arith.constant 0 : i32
    %c0_i32_1 = arith.constant 0 : i32
    return %2, %c0_i32_0 : i32, i32
  }
  func.func @transform_1(%arg0: i32, %arg1: i32) -> (i32, i32) {
    %c1_i32 = arith.constant 1 : i32
    %0 = arith.muli %arg0, %c1_i32 : i32
    %1 = arith.addi %0, %arg1 : i32
    %c0_i32 = arith.constant 0 : i32
    %2 = arith.minsi %1, %c0_i32 : i32
    %c0_i32_0 = arith.constant 0 : i32
    %c0_i32_1 = arith.constant 0 : i32
    return %2, %c0_i32_0 : i32, i32
  }
  func.func @transform_2(%arg0: i32, %arg1: i32) -> (i32, i32) {
    %c1_i32 = arith.constant 1 : i32
    %0 = arith.muli %arg0, %c1_i32 : i32
    %1 = arith.addi %0, %arg1 : i32
    %c0_i32 = arith.constant 0 : i32
    %2 = arith.minsi %1, %c0_i32 : i32
    %c0_i32_0 = arith.constant 0 : i32
    %c0_i32_1 = arith.constant 0 : i32
    return %2, %c0_i32_0 : i32, i32
  }
  func.func @transform_3(%arg0: i32, %arg1: i32) -> (i32, i32, i32) {
    %c0_i32 = arith.constant 0 : i32
    %c0_i32_0 = arith.constant 0 : i32
    %c0_i32_1 = arith.constant 0 : i32
    return %arg0, %c0_i32, %c0_i32_0 : i32, i32, i32
  }
  func.func @transform_4(%arg0: i32, %arg1: i32) -> (i32, i32, i32) {
    %c0_i32 = arith.constant 0 : i32
    %c0_i32_0 = arith.constant 0 : i32
    %c0_i32_1 = arith.constant 0 : i32
    return %arg0, %c0_i32, %c0_i32_0 : i32, i32, i32
  }
  func.func @transform_5(%arg0: i32, %arg1: i32) -> (i32, i32, i32) {
    %c0_i32 = arith.constant 0 : i32
    %c0_i32_0 = arith.constant 0 : i32
    %c0_i32_1 = arith.constant 0 : i32
    return %arg0, %c0_i32, %c0_i32_0 : i32, i32, i32
  }
}

</mosaic_0001>

<bundles_post_ra>
// kernel: tpu_custom_call.1
= control target key start
LH: loop header
LB: loop body
LE: loop exit
PB: predicated region body
PF: predicated region fallthrough
CT: control target
= control target key end

     0   :  { %s1442_s0 = inlined_call_operand.hbm [shape: f32[16,128], index: 0, kind: input, shape index: {}]   ;;  %s1443_s1 = inlined_call_operand.hbm [shape: f32[16,128], index: 1, kind: input, shape index: {}]   ;;  %s1444_s2 = inlined_call_operand.hbm [shape: f32[16,128], index: 2, kind: input, shape index: {}]   ;;  %s1445_s3 = inlined_call_operand.hbm [shape: f32[2,8,128], index: 3, kind: output, shape index: {0}]   ;;  %s1446_s4 = inlined_call_operand.hbm [shape: f32[2,8,128], index: 4, kind: output, shape index: {1}]   ;;  %s1447_s5 = inlined_call_operand.hbm [shape: f32[2,8,128], index: 5, kind: output, shape index: {2}]  }
   0x1   :  { %1458 = sst [smem:[#allocation21_spill]] %s1443_s1 }
   0x2   :  { %11 = vsyncpa [#allocation3], 0 }
   0x3   :  { %13 = vsyncpa [#allocation3 + $0x1], 0 }
   0x4   :  { %14 = vsyncpa [#allocation6], 0 }
   0x5   :  { %16 = vsyncpa [#allocation6 + $0x1], 0 }
   0x6   :  { %17 = vsyncpa [#allocation4], 0 }
   0x7   :  { %19 = vsyncpa [#allocation4 + $0x1], 0 }
   0x8   :  { %20 = vsyncpa [#allocation10], 0 }
   0x9   :  { %22 = vsyncpa [#allocation10 + $0x1], 0  ;;  %s1110_s18 = smov 0   ;;  %s1112_s19 = smov 0  }
   0xa   :  { %s1114_s20 = smov 0   ;;  %s1116_s21 = smov 0  }
   0xb   :  { %s1118_s22 = smov 0   ;;  %s1120_s23 = smov 0  }
   0xc   :  { %s1122_s24 = smov 0   ;;  %s1124_s25 = smov 0  }
   0xd LB: > { %1459 = sst [smem:[#allocation16_spill]] %s1050_s20  ;;  %s1149_s26 = sadd.s32 4294967295, %s1070_s25   ;;  %s1070_s25 = sphi %s1124_s25, %s28_s25   ;;  %s1066_s24 = sphi %s1122_s24, %s1485_s24   ;;  %s1062_s23 = sphi %s1120_s23, %s1484_s23   ;;  %s1058_s22 = sphi %s1118_s22, %s1432_s22   ;;  %s1054_s21 = sphi %s1116_s21, %s1488_s21   ;;  %s1050_s20 = sphi %s1114_s20, %s1483_s20   ;;  %s1046_s19 = sphi %s1112_s19, %s1487_s19   ;;  %s1042_s18 = sphi %s1110_s18, %s1486_s18  }
   0xe   : > { %1460 = sst [smem:[#allocation17_spill]] %s1066_s24  ;;  %s1450_s27 = sadd.s32 4294967294, %s1070_s25  }
   0xf   : > { %1461 = sst [smem:[#allocation18_spill]] %s1070_s25  ;;  %s40_s28 = sadd.s32 1, %s1066_s24 }
  0x10   : > { %p42_p0 = scmp.ge.s32.totalorder %s40_s28, 2  ;;  %p1039_p1 = scmp.ne.s32.totalorder %s1058_s22, 0 }
  0x11   : > { %p61_p2 = scmp.eq.s32.totalorder %s1070_s25, 0  ;;  %p66_p3 = scmp.ne.s32.totalorder %s1058_s22, %s1054_s21 }
  0x12   : > { %s1490_s28 = smov (%p42_p0, %s40_s28), 0  ;;  %p67_p5 = scmp.eq.s32.totalorder %s1149_s26, 0 }
  0x13   : > { %1462 = sst [smem:[#allocation19_spill]] %s1490_s28  ;;  %p1158_p4 = por %p1039_p1, %p61_p2 }
  0x14   : > { %p1163_p6 = por %p67_p5, %p66_p3  ;;  %s140_s6 = ssub.s32 %s1066_s24, %s1490_s28 }
  0x15   : > { %p141_p7 = scmp.eq.s32.totalorder %s140_s6, 0  ;;  %s143_s7 = sadd.s32 1, %s1050_s20 }
  0x16   : > { %s1464_s30 = scalar_select %p1163_p6, 1, 0 }
  0x17   : > { %s1171_s8 = scalar_select %p141_p7, %s1050_s20, %s143_s7  }
  0x18   : > { %p153_p8 = scmp.ne.s32.totalorder %s1050_s20, %s1046_s19  ;;  %p154_p9 = scmp.eq.s32.totalorder %s1149_s26, 1 }
  0x19   : > { %1465 = sst [smem:[#allocation20_spill]] %s1171_s8  ;;  %p159_p10 = scmp.ne.s32.totalorder %s1046_s19, %s1042_s18 }
  0x1a   : > { %p160_p11 = scmp.eq.s32.totalorder %s1450_s27, 1  ;;  %p1180_p12 = por %p154_p9, %p153_p8 }
  0x1b   : > { %p736_p1 = scmp.lt.s32.totalorder %s1070_s25, 2  ;;  %s256_s12 = sand.u32 1, %s1070_s25  }
  0x1c   : > { %s1466_s9 = scalar_select %p1180_p12, 1, 0 }
  0x1d   : > { %p1185_p0 = por %p160_p11, %p159_p10  ;;  %p1192_p2 = pnand %p736_p1, %p1158_p4 }
  0x1e   : > { %s1072_s13 = smov [#allocation5]   ;;  %s1200_s15 = scalar_lea.sflag [#allocation6], %s256_s12 }
  0x1f   : > { %s1467_s10 = scalar_select %p1185_p0, 1, 0 }
  0x20   : > { %s1468_s11 = scalar_select %p1192_p2, 1, 0 }
  0x21   : > { %s270_s14 = sshll.u32 %s1072_s13, 4  ;;  %s1469_s1 = sld [smem:[#allocation21_spill]]  ;;  %s1197_s14 = int_to_ptr.vmem [resolvable:$true] %s270_s14 }
  0x22   : > { %p1210_p5 = pneg %p1192_p2 }
  0x27   : > { %s813_s21 = scalar_lea.hbm %s1469_s1, 256 }
  0x28   : > { %p814_p4 = scmp.ne.s32.totalorder %s1469_s1, %s813_s21  ;;  %p820_p9 = scmp.lt.u32.totalorder %s813_s21, %s813_s21 }
  0x29   : > { %p822_p10 = scmp.lt.u32.totalorder %s813_s21, %s1469_s1 }
  0x2a   : > { %p816_p7 = pnand %p1210_p5, %p814_p4 }
  0x2b   : > { %p823_p11 = por %p822_p10, %p820_p9 }
  0x2c   : > { %p817_p8 = pneg %p816_p7 }
  0x2e   : > { %p824_p1 = pnand %p823_p11, %p817_p8 }
  0x30   : > { %827 = shalt.err (!%p824_p1)
}
  0x31   : > { %s828_s16 = scalar_lea.vmem %s1197_s14, 256  ;;  %s835_s17 = scalar_lea.vmem %s1197_s14, 512 }
  0x32   : > { %p829_p13 = scmp.ne.s32.totalorder %s1197_s14, %s828_s16  ;;  %p836_p4 = scmp.lt.s32.totalorder %s1197_s14, %s1197_s14 }
  0x33   : > { %p837_p7 = scmp.lt.s32.totalorder %s835_s17, %s828_s16 }
  0x34   : > { %p831_p3 = pnand %p829_p13, %p1210_p5 }
  0x35   : > { %p838_p12 = por %p837_p7, %p836_p4 }
  0x36   : > { %p832_p0 = pneg %p831_p3 }
  0x38   : > { %p839_p6 = pnand %p838_p12, %p832_p0 }
  0x3a   : > { %842 = shalt.err (!%p839_p6)
}
  0x3b   : > { %s1073_s21 = smov 128   ;;  %s1074_s6 = smov 8  }
  0x3c   : > { %722 = dma.hbm_to_vmem [thread:$0]  (!%p1192_p2), %s1469_s1, 256, %s1197_s14, %s1200_s15, %s1073_s21, %s1073_s21, %s1074_s6  }
  0x3d   : > { %p302_p13 = scmp.lt.s32.totalorder %s1070_s25, 3  ;;  %p1471_p3 = scmp.ge.s32.totalorder %s1070_s25, 1 }
  0x3e   : > { %s1075_s16 = smov [#allocation2]   ;;  %s843_s24 = scalar_lea.hbm %s1442_s0, 256 }
  0x3f   : > { %p1239_p12 = pnand %p1471_p3, %p302_p13  ;;  %s246_s17 = sshll.u32 %s1075_s16, 4  ;;  %s247_s17 = int_to_ptr.vmem [resolvable:$true] %s246_s17 }
  0x40   : > { %p844_p6 = scmp.ne.s32.totalorder %s1442_s0, %s843_s24  ;;  %p850_p9 = scmp.lt.u32.totalorder %s843_s24, %s843_s24 }
  0x41   : > { %s1472_s13 = scalar_select %p1239_p12, 1, 0 }
  0x42   : > { %p846_p0 = pnand %p844_p6, %p1210_p5  ;;  %p852_p10 = scmp.lt.u32.totalorder %s843_s24, %s1442_s0 }
  0x44   : > { %p847_p8 = pneg %p846_p0  ;;  %p853_p11 = por %p852_p10, %p850_p9 }
  0x46   : > { %p854_p1 = pnand %p853_p11, %p847_p8 }
  0x48   : > { %857 = shalt.err (!%p854_p1)
}
  0x49   : > { %s858_s12 = scalar_lea.vmem %s247_s17, 256  ;;  %s865_s27 = scalar_lea.vmem %s247_s17, 512 }
  0x4a   : > { %p859_p4 = scmp.ne.s32.totalorder %s247_s17, %s858_s12  ;;  %p866_p3 = scmp.lt.s32.totalorder %s247_s17, %s247_s17 }
  0x4b   : > { %p867_p12 = scmp.lt.s32.totalorder %s865_s27, %s858_s12 }
  0x4c   : > { %p861_p7 = pnand %p859_p4, %p1210_p5 }
  0x4d   : > { %p868_p2 = por %p867_p12, %p866_p3 }
  0x4e   : > { %p862_p13 = pneg %p861_p7 }
  0x50   : > { %p869_p6 = pnand %p868_p2, %p862_p13 }
  0x52   : > { %872 = shalt.err (!%p869_p6)
}
  0x53   : > { %p1473_p0 = scmp.ne.s32.totalorder %s1468_s11, 0  ;;  %s1076_s28 = smov [#allocation7]  }
  0x54   : > { %s294_s8 = sshll.u32 %s1076_s28, 4  ;;  %s873_s7 = scalar_lea.hbm %s1444_s2, 256  ;;  %s295_s8 = int_to_ptr.vmem [resolvable:$true] %s294_s8 }
  0x55   : > { %719 = dma.hbm_to_vmem [thread:$0]  (!%p1473_p0), %s1442_s0, 256, %s247_s17, [#allocation3], %s1073_s21, %s1073_s21, %s1074_s6  }
  0x56   : > { %p874_p2 = scmp.ne.s32.totalorder %s1444_s2, %s873_s7  ;;  %p880_p9 = scmp.lt.u32.totalorder %s873_s7, %s873_s7 }
  0x57   : > { %p882_p10 = scmp.lt.u32.totalorder %s873_s7, %s1444_s2 }
  0x58   : > { %p876_p12 = pnand %p874_p2, %p1210_p5 }
  0x59   : > { %p883_p11 = por %p882_p10, %p880_p9 }
  0x5a   : > { %p877_p8 = pneg %p876_p12 }
  0x5c   : > { %p884_p1 = pnand %p883_p11, %p877_p8 }
  0x5e   : > { %887 = shalt.err (!%p884_p1)
}
  0x5f   : > { %s888_s17 = scalar_lea.vmem %s295_s8, 256  ;;  %s895_s20 = scalar_lea.vmem %s295_s8, 512 }
  0x60   : > { %p889_p4 = scmp.ne.s32.totalorder %s295_s8, %s888_s17  ;;  %p896_p3 = scmp.lt.s32.totalorder %s295_s8, %s295_s8 }
  0x61   : > { %p897_p6 = scmp.lt.s32.totalorder %s895_s20, %s888_s17 }
  0x62   : > { %p891_p7 = pnand %p889_p4, %p1210_p5 }
  0x63   : > { %p898_p0 = por %p897_p6, %p896_p3 }
  0x64   : > { %p892_p13 = pneg %p891_p7 }
  0x66   : > { %p899_p2 = pnand %p898_p0, %p892_p13 }
  0x68   : > { %902 = shalt.err (!%p899_p2)
}
  0x69   : > { %p1474_p12 = scmp.ne.s32.totalorder %s1468_s11, 0  ;;  %p1475_p8 = scmp.ne.s32.totalorder %s1472_s13, 0 }
  0x6a   : > { %s308_s29 = sand.u32 (!%p1475_p8), 1, %s1058_s22   ;;  %p1476_p5 = scmp.ne.s32.totalorder (!%p1475_p8), %s1464_s30, 0 }
  0x6b   : > { %725 = dma.hbm_to_vmem [thread:$0]  (!%p1474_p12), %s1444_s2, 256, %s295_s8, %s1200_s15, %s1073_s21, %s1073_s21, %s1074_s6  }
  0x6c   : > { %306 = sbr.rel (%p1475_p8) target bundleno = 196 (0xc4), region = 32  ;;  %s686_s24 = sshll.u32 (!%p1475_p8), %s308_s29, 4 }
  0x6d   : > { %s309_s28 = scalar_lea.sflag (!%p1475_p8), [#allocation3], %s308_s29  ;;  %s312_s16 = scalar_lea.vmem (!%p1475_p8), [#allocation2], %s686_s24 }
  0x73   : > { %1024 = dma.done.wait (%p1476_p5), %s309_s28, 256  }
  0x74   : > { %1026 = vsyncadd (%p1476_p5), %s309_s28, 4294967040  ;;  %s317_s11 = sand.u32 1, %s1149_s26   ;;  %s321_s21 = scalar_lea.vmem [#allocation5], %s686_s24 }
  0x75   : > { %s318_s15 = scalar_lea.sflag [#allocation6], %s317_s11 }
  0x76   : > { %1028 = dma.done.wait (%p1476_p5), %s318_s15, 512  }
  0x77   : > { %1030 = vsyncadd (%p1476_p5), %s318_s15, 4294966784  ;;  %v404_v0 = vlaneseq  ;;  %s360_s6 = sand.u32 1, %s1046_s19   ;;  %s692_s13 = sshll.u32 %s1062_s23, 4  ;;  %v396_v6 = vld [vmem:[%s312_s16] sm:$0xff]  ;;  %v397_v7 = vld [vmem:[%s312_s16 + $0x8] sm:$0xff] }
  0x78   : > { %v407_v2 = vstv %s692_s13  ;;  %s1304_s8 = sshll.u32 %s360_s6, 3  ;;  %s330_s14 = scalar_lea.vmem [#allocation7], %s686_s24  ;;  %v398_v11 = vld [vmem:[%s321_s21] sm:$0xff]  ;;  %v399_v12 = vld [vmem:[%s321_s21 + $0x8] sm:$0xff] }
  0x79   : > { %v405_v1 = vshrl.u32 %v404_v0, 7  ;;  %v400_v8 = vld [vmem:[%s330_s14] sm:$0xff]  ;;  %v401_v9 = vld [vmem:[%s330_s14 + $0x8] sm:$0xff]  ;;  %s376_s30 = scalar_lea.vmem [#allocation11], %s1304_s8  ;;  %s696_s12 = sshll.u32 %s1062_s23, 7 }
  0x7a   : > { %v412_v10 = vmul.f32 %v400_v8, %v396_v6  ;;  %v413_v13 = vmul.f32 %v401_v9, %v397_v7  ;;  %v424_v14 = vmul.f32 %v400_v8, %v398_v11  ;;  %v425_v15 = vmul.f32 %v401_v9, %v399_v12  ;;  %s490_s7 = sshll.u32 %s376_s30, 4  ;;  %s369_s27 = scalar_lea.vmem [#allocation9], %s1304_s8  ;;  %s1314_s7 = int_to_ptr.vmem [resolvable:$true] %s490_s7 }
  0x7b   : > { %v406_v3 = vadd.s32 8, %v405_v1  ;;  %v408_v4 = vadd.s32 %v407_v2, %v405_v1  ;;  %s477_s17 = sshll.u32 %s369_s27, 4  ;;  %s362_s20 = scalar_lea.vmem [#allocation8], %s1304_s8  ;;  %s1325_s17 = int_to_ptr.vmem [resolvable:$true] %s477_s17 }
  0x7c   : > { %v414_v17 = vmul.f32 %v412_v10, %v398_v11  ;;  %v415_v19 = vmul.f32 %v413_v13, %v399_v12  ;;  %s464_s1 = sshll.u32 %s362_s20, 4  ;;  %s1323_s23 = scalar_lea.hbm %s1446_s4, %s696_s12  ;;  %s1337_s1 = int_to_ptr.vmem [resolvable:$true] %s464_s1 }
  0x7d   : > { %v409_v5 = vadd.s32 %v407_v2, %v406_v3  ;;  %vm410_vm0 = vcmp.lt.s32.totalorder %v408_v4, 16  ;;  %s1330_s16 = scalar_lea.hbm %s1447_s5, %s696_s12  ;;  %s1335_s13 = scalar_lea.hbm %s1445_s3, %s696_s12 }
  0x7e   : > { %v422_v16 = vsel %vm410_vm0, %v412_v10, 0.0  ;;  %v426_v20 = vsel %vm410_vm0, %v424_v14, 0.0  ;;  %v420_v23 = vsel %vm410_vm0, %v414_v17, 0.0  ;;  %s1341_s14 = scalar_lea.sflag [#allocation10], %s317_s11  ;;  %s903_s25 = scalar_lea.vmem %s1325_s17, 128 }
  0x7f   : > { %vm411_vm1 = vcmp.lt.s32.totalorder %v409_v5, 16  ;;  %p904_p0 = scmp.ne.s32.totalorder %s1325_s17, %s903_s25  ;;  %p1477_p9 = scmp.ne.s32.totalorder %s1466_s9, 0 }
  0x80   : > { %v423_v18 = vsel %vm411_vm1, %v413_v13, 0.0  ;;  %v427_v21 = vsel %vm411_vm1, %v425_v15, 0.0  ;;  %v421_v25 = vsel %vm411_vm1, %v415_v19, 0.0  ;;  %s1077_s29 = smov [#allocation9]  }
  0x81   : > { %v433_v22 = vadd.f32 %v423_v18, %v422_v16  ;;  %v437_v24 = vadd.f32 %v427_v21, %v426_v20  ;;  %v429_v26 = vadd.f32 %v421_v25, %v420_v23  ;;  %p905_p10 = pnand %p904_p0, %p1477_p9  ;;  %s907_s24 = sshll.u32 %s1077_s29, 4  ;;  %s908_s24 = int_to_ptr.vmem [resolvable:$false] %s907_s24 }
  0x82   : > { %p910_p1 = scmp.lt.s32.totalorder %s1325_s17, %s908_s24 }
  0x83   : > { %435 = vst [vmem:[%s369_s27] sm:$0xff] %v433_v22  ;;  %439 = vst [vmem:[%s376_s30] sm:$0xff] %v437_v24  ;;  %p906_p11 = pneg %p905_p10  ;;  %s909_s27 = scalar_lea.vmem %s908_s24, 256 }
  0x84   : > { %p911_p4 = scmp.lt.s32.totalorder %s909_s27, %s903_s25 }
  0x86   : > { %p912_p7 = por %p911_p4, %p910_p1 }
  0x88   : > { %p913_p13 = pnand %p912_p7, %p906_p11 }
  0x8a   : > { %916 = shalt.err (!%p913_p13)
}
  0x8b   : > { %s917_s26 = scalar_lea.hbm %s1323_s23, 128  ;;  %s921_s12 = scalar_lea.hbm %s1446_s4, 256 }
  0x8c   : > { %p918_p3 = scmp.ne.s32.totalorder %s1323_s23, %s917_s26  ;;  %p922_p12 = scmp.lt.u32.totalorder %s1323_s23, %s1446_s4 }
  0x8d   : > { %p923_p8 = scmp.lt.u32.totalorder %s921_s12, %s917_s26  ;;  %p925_p0 = scmp.lt.u32.totalorder %s917_s26, %s1323_s23 }
  0x8e   : > { %p919_p6 = pnand %p918_p3, %p1477_p9 }
  0x8f   : > { %p924_p5 = por %p923_p8, %p922_p12 }
  0x90   : > { %p920_p2 = pneg %p919_p6 }
  0x91   : > { %p926_p10 = por %p925_p0, %p924_p5 }
  0x93   : > { %p927_p11 = pnand %p926_p10, %p920_p2 }
  0x95   : > { %930 = shalt.err (!%p927_p11)
}
  0x96   : > { %711 = dma.vmem_to_hbm [thread:$0]  (%p1477_p9), %s1325_s17, 128, %s1323_s23, %s1341_s14   ;;  %431 = vst [vmem:[%s362_s20] sm:$0xff] %v429_v26 }
  0x97   : > { %s931_s21 = scalar_lea.vmem %s1314_s7, 128  ;;  %s1078_s25 = smov [#allocation11]  }
  0x98   : > { %p932_p1 = scmp.ne.s32.totalorder %s1314_s7, %s931_s21  ;;  %s935_s29 = sshll.u32 %s1078_s25, 4  ;;  %s936_s29 = int_to_ptr.vmem [resolvable:$false] %s935_s29 }
  0x99   : > { %s937_s24 = scalar_lea.vmem %s936_s29, 256  ;;  %p938_p13 = scmp.lt.s32.totalorder %s1314_s7, %s936_s29 }
  0x9a   : > { %p933_p4 = pnand %p932_p1, %p1477_p9  ;;  %p939_p3 = scmp.lt.s32.totalorder %s937_s24, %s931_s21 }
  0x9c   : > { %p934_p7 = pneg %p933_p4  ;;  %p940_p6 = por %p939_p3, %p938_p13 }
  0x9e   : > { %p941_p2 = pnand %p940_p6, %p934_p7 }
  0xa0   : > { %944 = shalt.err (!%p941_p2)
}
  0xa1   : > { %s945_s8 = scalar_lea.hbm %s1330_s16, 128  ;;  %s949_s23 = scalar_lea.hbm %s1447_s5, 256 }
  0xa2   : > { %p946_p12 = scmp.ne.s32.totalorder %s1330_s16, %s945_s8  ;;  %p950_p0 = scmp.lt.u32.totalorder %s1330_s16, %s1447_s5 }
  0xa3   : > { %p951_p10 = scmp.lt.u32.totalorder %s949_s23, %s945_s8  ;;  %p953_p1 = scmp.lt.u32.totalorder %s945_s8, %s1330_s16 }
  0xa4   : > { %p947_p8 = pnand %p946_p12, %p1477_p9 }
  0xa5   : > { %p952_p11 = por %p951_p10, %p950_p0 }
  0xa6   : > { %p948_p5 = pneg %p947_p8 }
  0xa7   : > { %p954_p4 = por %p953_p1, %p952_p11 }
  0xa9   : > { %p955_p7 = pnand %p954_p4, %p948_p5 }
  0xab   : > { %958 = shalt.err (!%p955_p7)
}
  0xac   : > { %712 = dma.vmem_to_hbm [thread:$0]  (%p1477_p9), %s1314_s7, 128, %s1330_s16, %s1341_s14  }
  0xad   : > { %s441_s11 = scalar_lea.sflag [#allocation4], %s360_s6  ;;  %s959_s30 = scalar_lea.vmem %s1337_s1, 128 }
  0xae   : > { %p960_p13 = scmp.ne.s32.totalorder %s1337_s1, %s959_s30  ;;  %s1079_s12 = smov [#allocation8]  }
  0xaf   : > { %s963_s28 = sshll.u32 %s1079_s12, 4  ;;  %s964_s28 = int_to_ptr.vmem [resolvable:$false] %s963_s28 }
  0xb0   : > { %p961_p3 = pnand %p960_p13, %p1477_p9  ;;  %s965_s15 = scalar_lea.vmem %s964_s28, 256 }
  0xb1   : > { %p966_p2 = scmp.lt.s32.totalorder %s1337_s1, %s964_s28  ;;  %p967_p12 = scmp.lt.s32.totalorder %s965_s15, %s959_s30 }
  0xb2   : > { %p962_p6 = pneg %p961_p3 }
  0xb3   : > { %p968_p8 = por %p967_p12, %p966_p2 }
  0xb5   : > { %p969_p5 = pnand %p968_p8, %p962_p6 }
  0xb7   : > { %972 = shalt.err (!%p969_p5)
}
  0xb8   : > { %s973_s6 = scalar_lea.hbm %s1335_s13, 128  ;;  %s977_s14 = scalar_lea.hbm %s1445_s3, 256 }
  0xb9   : > { %p974_p0 = scmp.ne.s32.totalorder %s1335_s13, %s973_s6  ;;  %p978_p1 = scmp.lt.u32.totalorder %s1335_s13, %s1445_s3 }
  0xba   : > { %p979_p4 = scmp.lt.u32.totalorder %s977_s14, %s973_s6  ;;  %p981_p13 = scmp.lt.u32.totalorder %s973_s6, %s1335_s13 }
  0xbb   : > { %p975_p10 = pnand %p974_p0, %p1477_p9 }
  0xbc   : > { %p980_p7 = por %p979_p4, %p978_p1 }
  0xbd   : > { %p976_p11 = pneg %p975_p10 }
  0xbe   : > { %p982_p3 = por %p981_p13, %p980_p7 }
  0xc0   : > { %p983_p6 = pnand %p982_p3, %p976_p11 }
  0xc2   : > { %986 = shalt.err (!%p983_p6)
}
  0xc3   : > { %710 = dma.vmem_to_hbm [thread:$0]  (%p1477_p9), %s1337_s1, 128, %s1335_s13, %s441_s11  }
  0xc4 PF: > { %s1478_s29 = sld [smem:[#allocation18_spill]]  ;;  %s502_s24 = sand.u32 1, %s1042_s18  }
  0xc5   : > { %p1479_p2 = scmp.ne.s32.totalorder %s1467_s10, 0  ;;  %s503_s8 = scalar_lea.sflag [#allocation4], %s502_s24 }
  0xca   : > { %p1480_p12 = scmp.ge.s32.totalorder %s1478_s29, 2 }
  0xcc   : > { %p727_p8 = pnand %p1480_p12, %p1479_p2 }
  0xce   : > { %1032 = dma.done.wait (!%p727_p8), %s503_s8, 128  }
  0xcf   : > { %1034 = vsyncadd (!%p727_p8), %s503_s8, 4294967168  ;;  %s1481_s17 = sadd.s32 4294967294, %s1478_s29  }
  0xd0   : > { %s511_s20 = sand.u32 1, %s1481_s17  }
  0xd1   : > { %s512_s23 = scalar_lea.sflag [#allocation10], %s511_s20 }
  0xd2   : > { %1036 = dma.done.wait (!%p727_p8), %s512_s23, 256  }
  0xd3   : > { %1038 = vsyncadd (!%p727_p8), %s512_s23, 4294967040  ;;  %s28_s25 = sadd.s32 1, %s1478_s29   ;;  %s1482_s9 = sld [smem:[#allocation16_spill]] }
  0xd4   : > { %p25_p9 = scmp.ge.s32.totalorder %s28_s25, 4   ;;  %s1483_s20 = sld [smem:[#allocation20_spill]] }
  0xd5   : > { %s1484_s23 = sld [smem:[#allocation17_spill]]  ;;  %s1485_s24 = sld [smem:[#allocation19_spill]] }
  0xd6   : > { %s1486_s18 = smov %s1046_s19  ;;  %s1488_s21 = smov %s1058_s22 }
  0xd7   : > { %s1432_s22 = smov 0   ;;  %27 = sbr.rel (!%p25_p9) target bundleno = 13 (0xd), region = 137 }
  0xd9   : > { %s1487_s19 = smov %s1482_s9 }
  0xde   :  { %526 = vsyncpa [#allocation3], 1 }
  0xdf   :  { %528 = vsyncpa [#allocation3 + $0x1], 1 }
  0xe0   :  { %529 = vsyncpa [#allocation6], 1 }
  0xe1   :  { %531 = vsyncpa [#allocation6 + $0x1], 1 }
  0xe2   :  { %532 = vsyncpa [#allocation4], 1 }
  0xe3   :  { %534 = vsyncpa [#allocation4 + $0x1], 1 }
  0xe4   :  { %535 = vsyncpa [#allocation10], 1 }
  0xe5   :  { %537 = vsyncpa [#allocation10 + $0x1], 1 }

</bundles_post_ra>
